<compile_context>
chip_gen: v7x
topology: tpu7x:2x2x1
jax: 0.10.0
libtpu: 0.0.40
codegen_flags: <defaults>
</compile_context>

<pallas_src>
import math
import numpy as np
import jax
import jax.numpy as jnp
from jax.experimental import pallas as pl
from jax.experimental.pallas import tpu as pltpu


def _round_up(v: int, m: int) -> int:
    return ((v + m - 1) // m) * m


_LANE = 128     # lane width: pad feature dims to this for lane-dense tiles/stores
_SUBLANE = 16   # row-tile granularity covering bf16 (16) and f32 (8) sublane packing


def _choose_row_tile(M: int, tm_max: int = 512):
    """Pick (tile, M_pad) with tile a multiple of 16, tile <= tm_max, small
    zero-row padding, and >= 2 grid steps whenever possible (v7x megacore)."""
    M_min = _round_up(max(M, 1), _SUBLANE)
    n_steps = max(1, -(-M_min // tm_max))
    if M_min > _SUBLANE:
        n_steps = max(n_steps, 2)          # give both TensorCores work on v7x
    tile = _round_up(-(-M_min // n_steps), _SUBLANE)
    return tile, tile * n_steps


# ----------------------------- Slicer (host-side index arithmetic) ----------
class SlicerJax:
    def __init__(self, max_blocks: int, block_mask: np.ndarray) -> None:
        block_mask = np.asarray(block_mask).astype(bool)
        self.block_size = block_mask.shape[0]
        self.num_kept_tokens = int(block_mask.sum())
        kept_indices = np.tile(np.where(block_mask)[0], max_blocks)
        offsets = np.repeat(np.arange(max_blocks), self.num_kept_tokens)
        self.indices = kept_indices + self.block_size * offsets  # buffer

    def compute_slice(self, num_steps: int, prev_steps: int = 0) -> np.ndarray:
        total_steps = num_steps + prev_steps
        num_blocks = math.ceil(total_steps / self.block_size)
        indices = self.indices[: num_blocks * self.num_kept_tokens]
        keep = np.logical_and(prev_steps <= indices, indices < total_steps)
        return (indices[keep] - prev_steps).astype(np.int32)


# ----------------------------- Pallas kernel: fused 2-layer MLP head --------
def _head_mlp_kernel(x_ref, w1_ref, b1_ref, w2_ref, b2_ref, o_ref):
    # x: (TM, Ep) bf16, w1: (Ep, Hp) bf16, b1: (1, Hp) f32,
    # w2: (Hp, Op) bf16, b2: (1, Op) f32, o: (TM, Op) f32.
    # Hp, Op are 128-multiples -> lane-dense matmuls and unmasked stores.
    h = jnp.dot(x_ref[...], w1_ref[...], preferred_element_type=jnp.float32)
    h = jnp.maximum(h + b1_ref[...], 0.0)                       # ReLU (f32)
    out = jnp.dot(h.astype(w2_ref.dtype), w2_ref[...],
                  preferred_element_type=jnp.float32)
    o_ref[...] = (out + b2_ref[...]).astype(o_ref.dtype)


def head_mlp_pallas(x2d, w1, b1, w2, b2, tile, out_dtype=jnp.float32):
    """x2d: (M_pad, Ep) bf16 with M_pad % tile == 0; weights pre-padded Ep/Hp/Op."""
    M_pad, Ep = x2d.shape
    Hp = w1.shape[1]
    Op = w2.shape[1]
    assert M_pad % tile == 0 and tile % _SUBLANE == 0
    grid = (M_pad // tile,)

    def nbytes(a):
        return int(np.prod(a.shape)) * jnp.dtype(a.dtype).itemsize

    cost = pl.CostEstimate(
        flops=2 * M_pad * (Ep * Hp + Hp * Op),
        transcendentals=0,
        bytes_accessed=(nbytes(x2d) + nbytes(w1) + nbytes(b1) + nbytes(w2)
                        + nbytes(b2) + M_pad * Op * jnp.dtype(out_dtype).itemsize),
    )

    return pl.pallas_call(
        _head_mlp_kernel,
        out_shape=jax.ShapeDtypeStruct((M_pad, Op), out_dtype),
        grid=grid,
        in_specs=[
            # x tiles walk the row (M) axis.
            pl.BlockSpec((tile, Ep), lambda i: (i, 0)),
            # Weights / biases: same block every step -> stay VMEM-resident.
            pl.BlockSpec((Ep, Hp), lambda i: (0, 0)),
            pl.BlockSpec((1, Hp), lambda i: (0, 0)),
            pl.BlockSpec((Hp, Op), lambda i: (0, 0)),
            pl.BlockSpec((1, Op), lambda i: (0, 0)),
        ],
        out_specs=pl.BlockSpec((tile, Op), lambda i: (i, 0)),
        compiler_params=pltpu.CompilerParams(
            dimension_semantics=("parallel",),
            vmem_limit_bytes=64 * 1024 * 1024),
        cost_estimate=cost,
    )(x2d, w1, b1, w2, b2)


# ----------------------------- Head module -----------------------------------
class HeadJax(SlicerJax):
    """Head: slice kept tokens, then apply a Linear->ReLU->Linear head."""

    def __init__(self, max_blocks, block_mask, embed_dim, hidden_dim, out_dim, key):
        super().__init__(max_blocks, block_mask)
        k1, k2, k3, k4 = jax.random.split(key, 4)
        # Deterministic synthetic parameters (Kaiming-ish scaling); f32 copies
        # kept for the pure-JAX references.
        self.w1 = jax.random.normal(k1, (embed_dim, hidden_dim), jnp.float32) / np.sqrt(embed_dim)
        self.b1 = jax.random.normal(k2, (1, hidden_dim), jnp.float32) * 0.01
        self.w2 = jax.random.normal(k3, (hidden_dim, out_dim), jnp.float32) / np.sqrt(hidden_dim)
        self.b2 = jax.random.normal(k4, (1, out_dim), jnp.float32) * 0.01
        self.embed_dim = embed_dim
        self.hidden_dim = hidden_dim
        self.out_dim = out_dim

        # Pad feature dims once at init.  Padded hidden columns see zero weight
        # + zero bias -> relu(0) = 0, padded w2 rows/cols are zero, padded E
        # columns of x are zero -> the first out_dim output columns are exact
        # (up to bf16 rounding of the real entries).
        Ep = _round_up(embed_dim, _LANE)
        Hp = _round_up(hidden_dim, 256) if hidden_dim > 128 else _round_up(hidden_dim, _LANE)
        Op = _round_up(out_dim, _LANE)
        self.Ep, self.Hp, self.Op = Ep, Hp, Op
        # Weights streamed in bf16 (MXU-native), biases kept f32 (added to the
        # f32 accumulator).
        self.w1_p = (jnp.zeros((Ep, Hp), jnp.float32)
                     .at[:embed_dim, :hidden_dim].set(self.w1)).astype(jnp.bfloat16)
        self.b1_p = jnp.zeros((1, Hp), jnp.float32).at[:, :hidden_dim].set(self.b1)
        self.w2_p = (jnp.zeros((Hp, Op), jnp.float32)
                     .at[:hidden_dim, :out_dim].set(self.w2)).astype(jnp.bfloat16)
        self.b2_p = jnp.zeros((1, Op), jnp.float32).at[:, :out_dim].set(self.b2)

    def forward(self, x, num_steps: int, prev_steps: int, tm_max: int = 512):
        # x: (B, num_steps, E)
        idx = self.compute_slice(num_steps, prev_steps)
        B, _, E = x.shape
        K = idx.shape[0]
        if K == 0:
            return jnp.zeros((B, 0, self.out_dim), x.dtype)

        # glue: token gather with static indices + flatten (batch, token) rows.
        x_sliced = jnp.take(x, jnp.asarray(idx), axis=1)        # (B, K, E)
        x2d = x_sliced.reshape(B * K, E)                        # (M, E)

        # Pad rows to a tile multiple (small waste, >= 2 grid steps when
        # possible) and columns to Ep; stream x in bf16.
        M = B * K
        tile, M_pad = _choose_row_tile(M, tm_max)
        x2d = jnp.pad(x2d, ((0, M_pad - M), (0, self.Ep - E))).astype(jnp.bfloat16)

        y2d = head_mlp_pallas(x2d, self.w1_p, self.b1_p, self.w2_p, self.b2_p,
                              tile, out_dtype=jnp.float32)
        y2d = y2d[:M, :self.out_dim]                            # drop row/col padding
        return y2d.reshape(B, K, self.out_dim).astype(x.dtype)


# ----------------------------- references (pure JAX) --------------------------
def reference_forward_f32(head: HeadJax, x, num_steps, prev_steps):
    idx = head.compute_slice(num_steps, prev_steps)
    xs = x[:, jnp.asarray(idx)]
    h = jnp.maximum(xs @ head.w1 + head.b1[0], 0.0)
    return h @ head.w2 + head.b2[0]


def reference_forward_bf16(head: HeadJax, x, num_steps, prev_steps):
    # Same bf16 quantization of the matmul operands as the kernel, f32 accum.
    idx = head.compute_slice(num_steps, prev_steps)
    xs = x[:, jnp.asarray(idx)].astype(jnp.bfloat16)
    h = jnp.dot(xs, head.w1.astype(jnp.bfloat16),
                preferred_element_type=jnp.float32) + head.b1[0]
    h = jnp.maximum(h, 0.0)
    out = jnp.dot(h.astype(jnp.bfloat16), head.w2.astype(jnp.bfloat16),
                  preferred_element_type=jnp.float32) + head.b2[0]
    return out


if __name__ == "__main__":
    key = jax.random.PRNGKey(0)
    kx, kp = jax.random.split(key)

    # Module config (small, deterministic)
    max_blocks = 4
    block_mask = np.array([0, 1, 0, 1, 0, 0, 1, 0], dtype=bool)  # block_size=8, 3 kept/block
    embed_dim, hidden_dim, out_dim = 32, 64, 10

    head = HeadJax(max_blocks, block_mask, embed_dim, hidden_dim, out_dim, kp)

    # Forward config: x holds the current chunk of num_steps tokens.
    # B=4, num_steps=16, prev=4 -> K=6 kept tokens/batch -> M=24 rows
    # -> tile=16, M_pad=32 -> 2 grid steps (exercises the tiled/pipelined path).
    B, num_steps, prev_steps = 4, 16, 4
    x = jax.random.normal(kx, (B, num_steps, embed_dim), jnp.float32)

    out = head.forward(x, num_steps, prev_steps)
    out = jax.block_until_ready(out)

    ref_bf16 = jax.block_until_ready(reference_forward_bf16(head, x, num_steps, prev_steps))
    ref_f32 = jax.block_until_ready(reference_forward_f32(head, x, num_steps, prev_steps))
    assert out.shape == ref_f32.shape, (out.shape, ref_f32.shape)
    # Tight check against the bf16-matched reference (same operand quantization).
    np.testing.assert_allclose(np.asarray(out), np.asarray(ref_bf16), rtol=1e-2, atol=1e-2)
    # Loose sanity check against the f32 reference (bf16 quantization error).
    np.testing.assert_allclose(np.asarray(out), np.asarray(ref_f32), rtol=5e-2, atol=5e-2)

    print("KERNEL_OK")
</pallas_src>

<mosaic_0001>
module attributes {stable_mosaic.version = 11 : i64} {
  func.func @_head_mlp_kernel(%arg0: i32, %arg1: memref<16x128xbf16, #tpu.memory_space<vmem>>, %arg2: memref<128x128xbf16, #tpu.memory_space<vmem>>, %arg3: memref<1x128xf32, #tpu.memory_space<vmem>>, %arg4: memref<128x128xbf16, #tpu.memory_space<vmem>>, %arg5: memref<1x128xf32, #tpu.memory_space<vmem>>, %arg6: memref<16x128xf32, #tpu.memory_space<vmem>>) attributes {dimension_semantics = [#tpu.dimension_semantics<parallel>], iteration_bounds = array<i64: 2>, scalar_prefetch = 0 : i64, scratch_operands = 0 : i64, tpu.core_type = #tpu.core_type<tc>, window_params = [{transform_indices = @transform_0, window_bounds = array<i64: 16, 128>}, {pipeline_mode = #tpu.pipeline_mode<synchronous>, transform_indices = @transform_1, window_bounds = array<i64: 128, 128>}, {pipeline_mode = #tpu.pipeline_mode<synchronous>, transform_indices = @transform_2, window_bounds = array<i64: 1, 128>}, {pipeline_mode = #tpu.pipeline_mode<synchronous>, transform_indices = @transform_3, window_bounds = array<i64: 128, 128>}, {pipeline_mode = #tpu.pipeline_mode<synchronous>, transform_indices = @transform_4, window_bounds = array<i64: 1, 128>}, {transform_indices = @transform_5, window_bounds = array<i64: 16, 128>}]} {
    %c0 = arith.constant 0 : index
    %c0_0 = arith.constant 0 : index
    %0 = vector.load %arg1[%c0, %c0_0] : memref<16x128xbf16, #tpu.memory_space<vmem>>, vector<16x128xbf16>
    %c0_1 = arith.constant 0 : index
    %c0_2 = arith.constant 0 : index
    %1 = vector.load %arg2[%c0_1, %c0_2] : memref<128x128xbf16, #tpu.memory_space<vmem>>, vector<128x128xbf16>
    %cst = arith.constant dense<0.000000e+00> : vector<16x128xf32>
    %2 = tpu.matmul %0, %1, %cst {dimension_numbers = #tpu.dot_dimension_numbers<[1], [0], [0], [1], [0, 0, 1, 1], [], []>} : vector<16x128xbf16>, vector<128x128xbf16>, vector<16x128xf32> -> vector<16x128xf32>
    %c0_3 = arith.constant 0 : index
    %c0_4 = arith.constant 0 : index
    %3 = vector.load %arg3[%c0_3, %c0_4] : memref<1x128xf32, #tpu.memory_space<vmem>>, vector<1x128xf32>
    %4 = vector.broadcast %3 : vector<1x128xf32> to vector<16x128xf32>
    %5 = arith.addf %2, %4 : vector<16x128xf32>
    %cst_5 = arith.constant 0.000000e+00 : f32
    %6 = vector.broadcast %cst_5 : f32 to vector<16x128xf32>
    %7 = arith.maximumf %5, %6 : vector<16x128xf32>
    %8 = arith.truncf %7 : vector<16x128xf32> to vector<16x128xbf16>
    %c0_6 = arith.constant 0 : index
    %c0_7 = arith.constant 0 : index
    %9 = vector.load %arg4[%c0_6, %c0_7] : memref<128x128xbf16, #tpu.memory_space<vmem>>, vector<128x128xbf16>
    %cst_8 = arith.constant dense<0.000000e+00> : vector<16x128xf32>
    %10 = tpu.matmul %8, %9, %cst_8 {dimension_numbers = #tpu.dot_dimension_numbers<[1], [0], [0], [1], [0, 0, 1, 1], [], []>} : vector<16x128xbf16>, vector<128x128xbf16>, vector<16x128xf32> -> vector<16x128xf32>
    %c0_9 = arith.constant 0 : index
    %c0_10 = arith.constant 0 : index
    %11 = vector.load %arg5[%c0_9, %c0_10] : memref<1x128xf32, #tpu.memory_space<vmem>>, vector<1x128xf32>
    %12 = vector.broadcast %11 : vector<1x128xf32> to vector<16x128xf32>
    %13 = arith.addf %10, %12 : vector<16x128xf32>
    %c0_11 = arith.constant 0 : index
    %c0_12 = arith.constant 0 : index
    %14 = vector.load %arg6[%c0_11, %c0_12] : memref<16x128xf32, #tpu.memory_space<vmem>>, vector<16x128xf32>
    tpu.vector_store %arg6[%c0_11, %c0_12], %13 {strides = array<i32>} : memref<16x128xf32, #tpu.memory_space<vmem>>, vector<16x128xf32>,
    return
  }
  func.func @transform_0(%arg0: i32) -> (i32, i32) {
    %c0_i32 = arith.constant 0 : i32
    %c0_i32_0 = arith.constant 0 : i32
    return %arg0, %c0_i32 : i32, i32
  }
  func.func @transform_1(%arg0: i32) -> (i32, i32) {
    %c0_i32 = arith.constant 0 : i32
    %c0_i32_0 = arith.constant 0 : i32
    %c0_i32_1 = arith.constant 0 : i32
    return %c0_i32, %c0_i32_0 : i32, i32
  }
  func.func @transform_2(%arg0: i32) -> (i32, i32) {
    %c0_i32 = arith.constant 0 : i32
    %c0_i32_0 = arith.constant 0 : i32
    %c0_i32_1 = arith.constant 0 : i32
    return %c0_i32, %c0_i32_0 : i32, i32
  }
  func.func @transform_3(%arg0: i32) -> (i32, i32) {
    %c0_i32 = arith.constant 0 : i32
    %c0_i32_0 = arith.constant 0 : i32
    %c0_i32_1 = arith.constant 0 : i32
    return %c0_i32, %c0_i32_0 : i32, i32
  }
  func.func @transform_4(%arg0: i32) -> (i32, i32) {
    %c0_i32 = arith.constant 0 : i32
    %c0_i32_0 = arith.constant 0 : i32
    %c0_i32_1 = arith.constant 0 : i32
    return %c0_i32, %c0_i32_0 : i32, i32
  }
  func.func @transform_5(%arg0: i32) -> (i32, i32) {
    %c0_i32 = arith.constant 0 : i32
    %c0_i32_0 = arith.constant 0 : i32
    return %arg0, %c0_i32 : i32, i32
  }
}

</mosaic_0001>

<bundles_post_ra>
// kernel: tpu_custom_call.1
= control target key start
LH: loop header
LB: loop body
LE: loop exit
PB: predicated region body
PF: predicated region fallthrough
CT: control target
= control target key end

     0   :  { %10 = vsyncpa [#allocation3], 0  ;;  %s1423_s0 = inlined_call_operand.hbm [shape: bf16[32,128], index: 0, kind: input, shape index: {}]   ;;  %s1424_s1 = inlined_call_operand.hbm [shape: bf16[128,128], index: 1, kind: input, shape index: {}]   ;;  %s1425_s2 = inlined_call_operand.hbm [shape: f32[1,128], index: 2, kind: input, shape index: {}]   ;;  %s1426_s3 = inlined_call_operand.hbm [shape: bf16[128,128], index: 3, kind: input, shape index: {}]   ;;  %s1427_s4 = inlined_call_operand.hbm [shape: f32[1,128], index: 4, kind: input, shape index: {}]   ;;  %s1428_s5 = inlined_call_operand.hbm [shape: f32[32,128], index: 5, kind: output, shape index: {}]  }
   0x1   :  { %12 = vsyncpa [#allocation3 + $0x1], 0 }
   0x2   :  { %13 = vsyncpa [#allocation6], 0 }
   0x3   :  { %14 = vsyncpa [#allocation9], 0 }
   0x4   :  { %15 = vsyncpa [#allocation4], 0 }
   0x5   :  { %17 = vsyncpa [#allocation4 + $0x1], 0  ;;  %s1133_s18 = smov 0   ;;  %s1135_s19 = smov 0  }
   0x6   :  { %s1137_s20 = smov 0   ;;  %s1139_s21 = smov 0  }
   0x7 LB: > { %s1154_s22 = sadd.s32 4294967295, %s1089_s21   ;;  %s662_s23 = sadd.s32 4294967294, %s1089_s21   ;;  %s1089_s21 = sphi %s1139_s21, %s1451_s21   ;;  %s1085_s20 = sphi %s1137_s20, %s1450_s20   ;;  %s1081_s19 = sphi %s1135_s19, %s1449_s19   ;;  %s1077_s18 = sphi %s1133_s18, %s1448_s18  }
   0x8   : > { %p43_p0 = scmp.ne.s32.totalorder %s1081_s19, %s1077_s18  ;;  %p1429_p1 = scmp.eq.s32.totalorder %s1154_s22, 0 }
   0x9   : > { %p157_p3 = scmp.eq.s32.totalorder %s662_s23, 1  ;;  %p663_p5 = scmp.ge.s32.totalorder %s1089_s21, 1 }
   0xa   : > { %p1163_p4 = por %p1429_p1, %p43_p0  ;;  %p164_p7 = scmp.lt.s32.totalorder %s1089_s21, 3 }
   0xb   : > { %p1168_p6 = por %p157_p3, %p43_p0  ;;  %s1091_s27 = smov [#allocation5]  }
   0xc   : > { %s1432_s24 = scalar_select %p1163_p4, 1, 0 }
   0xd   : > { %s1433_s25 = scalar_select %p1168_p6, 1, 0 }
   0xe   : > { %p1173_p8 = pnand %p663_p5, %p164_p7  ;;  %s176_s28 = sshll.u32 %s1091_s27, 4  ;;  %s1177_s28 = int_to_ptr.vmem [resolvable:$true] %s176_s28 }
   0xf   : > { %s1092_s30 = smov [#allocation8]   ;;  %s1093_s7 = smov [#allocation7]  }
  0x10   : > { %s1434_s26 = scalar_select %p1173_p8, 1, 0 }
  0x11   : > { %p783_p9 = pneg %p1173_p8  ;;  %s200_s6 = sshll.u32 %s1092_s30, 4  ;;  %s1188_s6 = int_to_ptr.vmem [resolvable:$true] %s200_s6 }
  0x12   : > { %s1190_s8 = sshll.u32 %s1093_s7, 4  ;;  %s873_s11 = scalar_lea.hbm %s1424_s1, 1024  ;;  %s191_s8 = int_to_ptr.vmem [resolvable:$true] %s1190_s8 }
  0x13   : > { %p1184_p11 = pnand %p783_p9, %p1429_p1  ;;  %p874_p12 = scmp.ne.s32.totalorder %s1424_s1, %s873_s11 }
  0x14   : > { %p880_p5 = scmp.lt.u32.totalorder %s873_s11, %s1424_s1 }
  0x15   : > { %p1200_p13 = pneg %p1184_p11 }
  0x17   : > { %p876_p0 = pnand %p1200_p13, %p874_p12 }
  0x19   : > { %p877_p3 = pneg %p876_p0 }
  0x1b   : > { %p882_p7 = pnand %p880_p5, %p877_p3 }
  0x1d   : > { %885 = shalt.err (!%p882_p7)
}
  0x1e   : > { %s886_s17 = scalar_lea.vmem %s1177_s28, 1024  ;;  %p894_p2 = scmp.lt.s32.totalorder %s1177_s28, %s1177_s28 }
  0x1f   : > { %p887_p9 = scmp.ne.s32.totalorder %s1177_s28, %s886_s17  ;;  %p895_p6 = scmp.lt.s32.totalorder %s886_s17, %s886_s17 }
  0x21   : > { %p889_p10 = pnand %p887_p9, %p1200_p13  ;;  %p896_p12 = por %p895_p6, %p894_p2 }
  0x23   : > { %p890_p1 = pneg %p889_p10 }
  0x25   : > { %p897_p0 = pnand %p896_p12, %p890_p1 }
  0x27   : > { %900 = shalt.err (!%p897_p0)
}
  0x28   : > { %s1094_s23 = smov 64   ;;  %s1095_s27 = smov 4  }
  0x29   : > { %786 = dma.hbm_to_vmem [thread:$0]  (!%p1184_p11), %s1424_s1, 1024, %s1177_s28, [#allocation6], %s1094_s23, %s1094_s23, %s1095_s27  }
  0x2a   : > { %s901_s11 = scalar_lea.hbm %s1426_s3, 1024 }
  0x2b   : > { %p902_p1 = scmp.ne.s32.totalorder %s1426_s3, %s901_s11  ;;  %p908_p10 = scmp.lt.u32.totalorder %s901_s11, %s1426_s3 }
  0x2d   : > { %p904_p2 = pnand %p902_p1, %p1200_p13 }
  0x2f   : > { %p905_p6 = pneg %p904_p2 }
  0x31   : > { %p910_p3 = pnand %p908_p10, %p905_p6 }
  0x33   : > { %913 = shalt.err (!%p910_p3)
}
  0x34   : > { %s914_s28 = scalar_lea.vmem %s1188_s6, 1024  ;;  %p922_p12 = scmp.lt.s32.totalorder %s1188_s6, %s1188_s6 }
  0x35   : > { %p915_p5 = scmp.ne.s32.totalorder %s1188_s6, %s914_s28  ;;  %p923_p0 = scmp.lt.s32.totalorder %s914_s28, %s914_s28 }
  0x37   : > { %p917_p7 = pnand %p915_p5, %p1200_p13  ;;  %p924_p1 = por %p923_p0, %p922_p12 }
  0x39   : > { %p918_p9 = pneg %p917_p7 }
  0x3b   : > { %p925_p2 = pnand %p924_p1, %p918_p9 }
  0x3d   : > { %928 = shalt.err (!%p925_p2)
}
  0x3e   : > { %792 = dma.hbm_to_vmem [thread:$0]  (!%p1184_p11), %s1426_s3, 1024, %s1188_s6, [#allocation9], %s1094_s23, %s1094_s23, %s1095_s27  }
  0x3f   : > { %s929_s10 = scalar_lea.hbm %s1425_s2, 16 }
  0x40   : > { %p930_p6 = scmp.ne.s32.totalorder %s1425_s2, %s929_s10  ;;  %p936_p5 = scmp.lt.u32.totalorder %s929_s10, %s1425_s2 }
  0x42   : > { %p932_p10 = pnand %p930_p6, %p1200_p13 }
  0x44   : > { %p933_p3 = pneg %p932_p10 }
  0x46   : > { %p938_p7 = pnand %p936_p5, %p933_p3 }
  0x48   : > { %941 = shalt.err (!%p938_p7)
}
  0x49   : > { %s942_s16 = scalar_lea.vmem %s191_s8, 16  ;;  %s949_s6 = scalar_lea.vmem %s191_s8, 32 }
  0x4a   : > { %p943_p9 = scmp.ne.s32.totalorder %s191_s8, %s942_s16  ;;  %p950_p1 = scmp.lt.s32.totalorder %s191_s8, %s191_s8 }
  0x4b   : > { %p951_p2 = scmp.lt.s32.totalorder %s949_s6, %s942_s16 }
  0x4c   : > { %p945_p12 = pnand %p943_p9, %p1200_p13 }
  0x4d   : > { %p952_p4 = por %p951_p2, %p950_p1 }
  0x4e   : > { %p946_p0 = pneg %p945_p12 }
  0x50   : > { %p953_p8 = pnand %p952_p4, %p946_p0 }
  0x52   : > { %956 = shalt.err (!%p953_p8)
}
  0x53   : > { %789 = dma.hbm_to_vmem [thread:$0]  (!%p1184_p11), %s1425_s2, 16, %s191_s8, [#allocation6]  }
  0x54   : > { %s1096_s30 = smov [#allocation10]   ;;  %s957_s11 = scalar_lea.hbm %s1427_s4, 16 }
  0x55   : > { %s214_s7 = sshll.u32 %s1096_s30, 4  ;;  %p958_p6 = scmp.ne.s32.totalorder %s1427_s4, %s957_s11  ;;  %s215_s7 = int_to_ptr.vmem [resolvable:$true] %s214_s7 }
  0x56   : > { %p964_p10 = scmp.lt.u32.totalorder %s957_s11, %s1427_s4 }
  0x57   : > { %p960_p4 = pnand %p958_p6, %p1200_p13 }
  0x59   : > { %p961_p8 = pneg %p960_p4 }
  0x5b   : > { %p966_p3 = pnand %p964_p10, %p961_p8 }
  0x5d   : > { %969 = shalt.err (!%p966_p3)
}
  0x5e   : > { %s970_s8 = scalar_lea.vmem %s215_s7, 16  ;;  %s977_s6 = scalar_lea.vmem %s215_s7, 32 }
  0x5f   : > { %p971_p5 = scmp.ne.s32.totalorder %s215_s7, %s970_s8  ;;  %p978_p12 = scmp.lt.s32.totalorder %s215_s7, %s215_s7 }
  0x60   : > { %p979_p0 = scmp.lt.s32.totalorder %s977_s6, %s970_s8 }
  0x61   : > { %p973_p7 = pnand %p971_p5, %p1200_p13 }
  0x62   : > { %p980_p1 = por %p979_p0, %p978_p12 }
  0x63   : > { %p974_p9 = pneg %p973_p7 }
  0x65   : > { %p981_p2 = pnand %p980_p1, %p974_p9 }
  0x67   : > { %984 = shalt.err (!%p981_p2)
}
  0x68   : > { %795 = dma.hbm_to_vmem [thread:$0]  (!%p1184_p11), %s1427_s4, 16, %s215_s7, [#allocation9]  }
  0x69   : > { %s1288_s14 = sadd.s32 1, %s1089_s21   ;;  %s30_s30 = sadd.s32 1, %s1085_s20 }
  0x6a   : > { %s27_s29 = ssub.s32 %s1089_s21, %s1288_s14  ;;  %p37_p13 = scmp.ne.s32.totalorder %s1085_s20, %s1081_s19 }
  0x6b   : > { %p28_p6 = scmp.eq.s32.totalorder %s27_s29, 0  ;;  %p38_p4 = scmp.eq.s32.totalorder %s1089_s21, 0 }
  0x6c   : > { %p1437_p8 = scmp.eq.s32.totalorder %s1154_s22, 1  ;;  %p808_p3 = scmp.lt.s32.totalorder %s1089_s21, 2 }
  0x6d   : > { %s1304_s10 = scalar_select %p28_p6, %s1085_s20, %s30_s30  }
  0x6e   : > { %p1298_p10 = por %p1437_p8, %p37_p13  ;;  %p39_p5 = por %p38_p4, %p37_p13 }
  0x6f   : > { %s225_s11 = sand.u32 1, %s1085_s20   ;;  %s703_s7 = sshll.u32 %s1089_s21, 7 }
  0x70   : > { %s669_s12 = sshll.u32 %s225_s11, 3  ;;  %s1311_s16 = scalar_lea.hbm %s1423_s0, %s703_s7 }
  0x71   : > { %s229_s8 = scalar_lea.vmem [#allocation2], %s669_s12  ;;  %p1315_p11 = pnand %p808_p3, %p39_p5 }
  0x72   : > { %s236_s6 = sshll.u32 %s229_s8, 4  ;;  %s1319_s17 = scalar_lea.sflag [#allocation3], %s225_s11  ;;  %s1313_s6 = int_to_ptr.vmem [resolvable:$true] %s236_s6 }
  0x73   : > { %s985_s30 = scalar_lea.hbm %s1311_s16, 128  ;;  %p987_p9 = pneg %p1315_p11 }
  0x74   : > { %p986_p7 = scmp.ne.s32.totalorder %s1311_s16, %s985_s30  ;;  %s990_s7 = scalar_lea.hbm %s1423_s0, 256 }
  0x75   : > { %p991_p1 = scmp.lt.u32.totalorder %s1311_s16, %s1423_s0  ;;  %p992_p2 = scmp.lt.u32.totalorder %s990_s7, %s985_s30 }
  0x76   : > { %p988_p12 = pnand %p987_p9, %p986_p7  ;;  %p994_p6 = scmp.lt.u32.totalorder %s985_s30, %s1311_s16 }
  0x77   : > { %p993_p13 = por %p992_p2, %p991_p1 }
  0x78   : > { %p989_p0 = pneg %p988_p12 }
  0x79   : > { %p995_p4 = por %p994_p6, %p993_p13 }
  0x7b   : > { %p996_p8 = pnand %p995_p4, %p989_p0 }
  0x7d   : > { %999 = shalt.err (!%p996_p8)
}
  0x7e   : > { %s1000_s11 = scalar_lea.vmem %s1313_s6, 128  ;;  %s1097_s8 = smov [#allocation2]  }
  0x7f   : > { %p1001_p3 = scmp.ne.s32.totalorder %s1313_s6, %s1000_s11  ;;  %s1005_s29 = sshll.u32 %s1097_s8, 4  ;;  %s1006_s29 = int_to_ptr.vmem [resolvable:$false] %s1005_s29 }
  0x80   : > { %s1007_s12 = scalar_lea.vmem %s1006_s29, 256  ;;  %p1008_p12 = scmp.lt.s32.totalorder %s1313_s6, %s1006_s29 }
  0x81   : > { %p1003_p5 = pnand %p1001_p3, %p987_p9  ;;  %p1009_p1 = scmp.lt.s32.totalorder %s1007_s12, %s1000_s11 }
  0x83   : > { %p1004_p7 = pneg %p1003_p5  ;;  %p1010_p2 = por %p1009_p1, %p1008_p12 }
  0x85   : > { %p1011_p13 = pnand %p1010_p2, %p1004_p7 }
  0x87   : > { %1014 = shalt.err (!%p1011_p13)
}
  0x88   : > { %799 = dma.hbm_to_vmem [thread:$0]  (!%p1315_p11), %s1311_s16, 128, %s1313_s6, %s1319_s17, %s1094_s23, %s1094_s23, %s1095_s27  }
  0x89   : > { %p1440_p9 = scmp.ne.s32.totalorder %s1434_s26, 0 }
  0x8a   : > { %s1353_s30 = sand.u32 (!%p1440_p9), 1, %s1081_s19   ;;  %p1441_p0 = scmp.ne.s32.totalorder (!%p1440_p9), %s1432_s24, 0 }
  0x8b   : > { %248 = sbr.rel (%p1440_p9) target bundleno = 639 (0x27f), region = 40  ;;  %s673_s7 = sshll.u32 (!%p1440_p9), %s1353_s30, 3 }
  0x8c   : > { %s251_s13 = scalar_lea.sflag (!%p1440_p9), [#allocation3], %s1353_s30  ;;  %s1357_s15 = scalar_lea.vmem (!%p1440_p9), [#allocation2], %s673_s7 }
  0x92   : > { %1060 = dma.done.wait (%p1441_p0), %s251_s13, 128  }
  0x93   : > { %1062 = vsyncadd (%p1441_p0), %s251_s13, 4294967168  ;;  %p1442_p11 = scmp.eq.s32.totalorder %s1154_s22, 0 }
  0x95   : > { %1064 = dma.done.wait (%p1442_p11), [#allocation6], 1040   ;;  %p1443_p6 = pmov %p1442_p11 }
  0x97   : > { %1066 = vsyncadd (%p1443_p6), [#allocation6], 4294966256  ;;  %p1444_p4 = pmov %p1443_p6 }
  0x99   : > { %1068 = dma.done.wait (%p1444_p4), [#allocation9], 1040   ;;  %p1445_p8 = pmov %p1444_p4 }
  0x9a   : > { %v1098_v0 = vmov 0.0   ;;  %vm1099_vm0 = vmmov 0   ;;  %v856_v1 = vld [vmem:[#allocation5] sm:$0xff]   ;;  %v857_v2 = vld [vmem:[#allocation5 + $0x8] sm:$0xff]   ;;  %v858_v3 = vld [vmem:[#allocation5 + $0x10] sm:$0xff]   ;;  %s678_s24 = sshll.u32 %s1353_s30, 4 }
  0x9b   : > { %1070 = vsyncadd (%p1445_p8), [#allocation9], 4294966256  ;;  %723 = vmatprep.subr.bf16.mxu0 %v1098_v0  ;;  %739 = vmatprep.mubr.msk.bf16.mxu0 %vm1099_vm0, %v1098_v0  ;;  %v865_v4 = vld [vmem:[#allocation8] sm:$0xff]   ;;  %v859_v5 = vld [vmem:[#allocation5 + $0x18] sm:$0xff]   ;;  %s296_s26 = scalar_lea.vmem [#allocation11], %s678_s24  ;;  %s704_s27 = sshll.u32 %s1154_s22, 8 }
  0x9c   : > { %743 = vmatprep.subr.bf16.mxu1 %v1098_v0  ;;  %759 = vmatprep.mubr.msk.bf16.mxu1 %vm1099_vm0, %v1098_v0  ;;  %v866_v6 = vld [vmem:[#allocation8 + $0x8] sm:$0xff]   ;;  %v860_v7 = vld [vmem:[#allocation5 + $0x20] sm:$0xff]   ;;  %v867_v8 = vld [vmem:[#allocation8 + $0x10] sm:$0xff]   ;;  %s551_s23 = sshll.u32 %s296_s26, 4  ;;  %s1379_s28 = scalar_lea.hbm %s1428_s5, %s704_s27  ;;  %s1374_s23 = int_to_ptr.vmem [resolvable:$true] %s551_s23 }
  0x9d   : > { %724 = vmatpush3.bf16.msra.mxu0 %v856_v1  ;;  %744 = vmatpush3.bf16.msra.mxu1 %v865_v4  ;;  %v861_v9 = vld [vmem:[#allocation5 + $0x28] sm:$0xff]   ;;  %v868_v10 = vld [vmem:[#allocation8 + $0x18] sm:$0xff]   ;;  %v862_v11 = vld [vmem:[#allocation5 + $0x30] sm:$0xff]   ;;  %s538_s17 = scalar_lea.sflag [#allocation4], %s1353_s30  ;;  %s1015_s22 = scalar_lea.vmem %s1374_s23, 256 }
  0x9e   : > { %725 = vmatprep.subr.bf16.mxu0 %v1098_v0  ;;  %745 = vmatprep.subr.bf16.mxu1 %v1098_v0  ;;  %v869_v12 = vld [vmem:[#allocation8 + $0x20] sm:$0xff]   ;;  %v863_v13 = vld [vmem:[#allocation5 + $0x38] sm:$0xff]   ;;  %v870_v14 = vld [vmem:[#allocation8 + $0x28] sm:$0xff]   ;;  %p1016_p3 = scmp.ne.s32.totalorder %s1374_s23, %s1015_s22  ;;  %s1100_s11 = smov [#allocation11]  }
  0x9f   : > { %v864_v15 = vld [vmem:[%s1357_s15] sm:$0xff]   ;;  %v679_v18 = vld [vmem:[#allocation7] ss:$0 sm:$0xff]  ;;  %v689_v28 = vld [vmem:[#allocation10] ss:$0 sm:$0xff]  ;;  %s1019_s8 = sshll.u32 %s1100_s11, 4  ;;  %s1020_s8 = int_to_ptr.vmem [resolvable:$false] %s1019_s8 }
  0xa0   : > { %v871_v16 = vld [vmem:[#allocation8 + $0x30] sm:$0xff]   ;;  %v872_v17 = vld [vmem:[#allocation8 + $0x38] sm:$0xff]   ;;  %p1017_p5 = pnand %p1016_p3, %p1298_p10  ;;  %s1021_s29 = scalar_lea.vmem %s1020_s8, 512 }
  0xa1   : > { %726 = vmatpush3.bf16.msra.mxu0 %v857_v2  ;;  %746 = vmatpush3.bf16.msra.mxu1 %v866_v6  ;;  %p1022_p12 = scmp.lt.s32.totalorder %s1374_s23, %s1020_s8  ;;  %p1023_p1 = scmp.lt.s32.totalorder %s1021_s29, %s1015_s22 }
  0xa2   : > { %727 = vmatprep.subr.bf16.mxu0 %v1098_v0  ;;  %747 = vmatprep.subr.bf16.mxu1 %v1098_v0  ;;  %p1018_p7 = pneg %p1017_p5 }
  0xa3   : > { %p1024_p2 = por %p1023_p1, %p1022_p12 }
  0xa5   : > { %728 = vmatpush3.bf16.msra.mxu0 %v858_v3  ;;  %748 = vmatpush3.bf16.msra.mxu1 %v867_v8  ;;  %p1025_p13 = pnand %p1024_p2, %p1018_p7 }
  0xa6   : > { %729 = vmatprep.subr.bf16.mxu0 %v1098_v0  ;;  %749 = vmatprep.subr.bf16.mxu1 %v1098_v0 }
  0xa9   : > { %730 = vmatpush3.bf16.msra.mxu0 %v859_v5  ;;  %750 = vmatpush3.bf16.msra.mxu1 %v868_v10 }
  0xaa   : > { %731 = vmatprep.subr.bf16.mxu0 %v1098_v0  ;;  %751 = vmatprep.subr.bf16.mxu1 %v1098_v0 }
  0xad   : > { %732 = vmatpush3.bf16.msra.mxu0 %v860_v7  ;;  %752 = vmatpush3.bf16.msra.mxu1 %v869_v12 }
  0xae   : > { %733 = vmatprep.subr.bf16.mxu0 %v1098_v0  ;;  %753 = vmatprep.subr.bf16.mxu1 %v1098_v0 }
  0xb1   : > { %734 = vmatpush3.bf16.msra.mxu0 %v861_v9  ;;  %754 = vmatpush3.bf16.msra.mxu1 %v870_v14 }
  0xb2   : > { %735 = vmatprep.subr.bf16.mxu0 %v1098_v0  ;;  %755 = vmatprep.subr.bf16.mxu1 %v1098_v0 }
  0xb5   : > { %736 = vmatpush3.bf16.msra.mxu0 %v862_v11  ;;  %756 = vmatpush3.bf16.msra.mxu1 %v871_v16 }
  0xb6   : > { %737 = vmatprep.subr.bf16.mxu0 %v1098_v0  ;;  %757 = vmatprep.subr.bf16.mxu1 %v1098_v0 }
  0xb9   : > { %738 = vmatpush3.bf16.msra.mxu0 %v863_v13  ;;  %758 = vmatpush3.bf16.msra.mxu1 %v872_v17 }
  0xbc   : > { %740 = vmatmul.mubr.bf16.vlgmr.msra.gmra.mrb[0].mxu0 %v864_v15 }
 0x18f   : > { %v413_v19 = vpop.f32.mrb[0].mxu0 }
 0x190   : > { %v414_v20 = vadd.f32 %v679_v18, %v413_v19  ;;  %v741_v21 = vpop.f32.mrb[1].mxu0 }
 0x191   : > { %v416_v22 = vpop.f32.mrb[2].mxu0 }
 0x192   : > { %v417_v23 = vadd.f32 %v679_v18, %v416_v22  ;;  %v742_v24 = vpop.f32.mrb[3].mxu0  ;;  %v420_v25 = vmax.f32 %v414_v20, 0.0 }
 0x194   : > { %v421_v26 = vmax.f32 %v417_v23, 0.0 }
 0x196   : > { %v422_v27 = vpack.c.bf16 %v421_v26, %v420_v25 }
 0x198   : > { %760 = vmatmul.mubr.bf16.vlgmr.msra.gmra.mrb[0].mxu1 %v422_v27 }
 0x26b   : > { %v528_v29 = vpop.f32.mrb[0].mxu1 }
 0x26c   : > { %v529_v30 = vadd.f32 %v689_v28, %v528_v29  ;;  %v761_v31 = vpop.f32.mrb[1].mxu1 }
 0x26d   : > { %v531_v32 = vpop.f32.mrb[2].mxu1 }
 0x26e   : > { %535 = vst [vmem:[%s296_s26] sm:$0xff] %v529_v30  ;;  %v532_v33 = vadd.f32 %v689_v28, %v531_v32  ;;  %v762_v34 = vpop.f32.mrb[3].mxu1 }
 0x270   : > { %536 = vst [vmem:[%s296_s26 + $0x8] sm:$0xff] %v532_v33 }
 0x271   : > { %1028 = shalt.err (!%p1025_p13)
}
 0x272   : > { %s1029_s12 = scalar_lea.hbm %s1379_s28, 256  ;;  %s1033_s15 = scalar_lea.hbm %s1428_s5, 512 }
 0x273   : > { %p1030_p9 = scmp.ne.s32.totalorder %s1379_s28, %s1029_s12  ;;  %p1034_p6 = scmp.lt.u32.totalorder %s1379_s28, %s1428_s5 }
 0x274   : > { %p1035_p4 = scmp.lt.u32.totalorder %s1033_s15, %s1029_s12  ;;  %p1037_p3 = scmp.lt.u32.totalorder %s1029_s12, %s1379_s28 }
 0x275   : > { %p1031_p0 = pnand %p1030_p9, %p1298_p10 }
 0x276   : > { %p1036_p8 = por %p1035_p4, %p1034_p6 }
 0x277   : > { %p1032_p11 = pneg %p1031_p0 }
 0x278   : > { %p1038_p5 = por %p1037_p3, %p1036_p8 }
 0x27a   : > { %p1039_p7 = pnand %p1038_p5, %p1032_p11 }
 0x27c   : > { %1042 = shalt.err (!%p1039_p7)
}
 0x27d   : > { %s1101_s27 = smov 128   ;;  %s1102_s16 = smov 8  }
 0x27e   : > { %781 = dma.vmem_to_hbm [thread:$0]  (%p1298_p10), %s1374_s23, 256, %s1379_s28, %s538_s17, %s1101_s27, %s1101_s27, %s1102_s16  }
 0x27f PF: > { %s566_s6 = sand.u32 1, %s1077_s18   ;;  %p1446_p12 = scmp.ne.s32.totalorder %s1433_s25, 0 }
 0x280   : > { %p1447_p1 = scmp.ge.s32.totalorder %s1089_s21, 2  ;;  %s567_s22 = scalar_lea.sflag [#allocation4], %s566_s6 }
 0x282   : > { %p801_p2 = pnand %p1447_p1, %p1446_p12 }
 0x284   : > { %1072 = dma.done.wait (!%p801_p2), %s567_s22, 256  }
 0x285   : > { %1074 = vsyncadd (!%p801_p2), %s567_s22, 4294967040  ;;  %p20_p13 = scmp.ge.s32.totalorder %s1288_s14, 4   ;;  %s1448_s18 = smov %s1081_s19 }
 0x286   : > { %s1449_s19 = smov %s1085_s20  ;;  %s1450_s20 = smov %s1304_s10 }
 0x287   : > { %s1451_s21 = smov %s1288_s14  ;;  %22 = sbr.rel (!%p20_p13) target bundleno = 7 (0x7), region = 101 }
 0x28e   :  { %572 = vsyncpa [#allocation3], 1 }
 0x28f   :  { %574 = vsyncpa [#allocation3 + $0x1], 1 }
 0x290   :  { %575 = vsyncpa [#allocation6], 1 }
 0x291   :  { %576 = vsyncpa [#allocation9], 1 }
 0x292   :  { %577 = vsyncpa [#allocation4], 1 }
 0x293   :  { %579 = vsyncpa [#allocation4 + $0x1], 1 }

</bundles_post_ra>
